<compile_context>
chip_gen: v5e
topology: v5e:2x2
jax: 0.10.0
libtpu: 0.0.40
codegen_flags: <defaults>
</compile_context>

<pallas_src>
import jax
import jax.numpy as jnp
from jax.experimental import pallas as pl
from jax.experimental.pallas import tpu as pltpu


def _fused_conv1x1_sum_relu_kernel(x1_ref, x2_ref, x3_ref, w_ref, b_ref, o_ref):
    # x?_ref: (1, Cin, T)   w_ref: (Cout, Cin)   b_ref: (Cout, 1)  (already 3*bias)
    # o_ref : (1, Cout, T)
    s = x1_ref[0] + x2_ref[0] + x3_ref[0]           # (Cin, T), pure VPU adds
    w = w_ref[...]                                   # (Cout, Cin), tiny resident tile
    cin = s.shape[0]

    # out[o, t] = 3*b[o] + sum_c w[o, c] * s[c, t]  via Cin broadcast-FMAs (no MXU).
    acc = b_ref[...] + w[:, 0:1] * s[0:1, :]         # bias folded into the init
    for c in range(1, cin):
        acc = acc + w[:, c:c + 1] * s[c:c + 1, :]

    o_ref[0] = jnp.maximum(acc, 0.0).astype(o_ref.dtype)


def _round_up(x, m):
    return ((x + m - 1) // m) * m


def _num_tensorcores_per_chip():
    """Best-effort detection of dual-TC chips (v7x); default to 1 TC."""
    try:
        kind = jax.devices()[0].device_kind.lower()
        if "v7" in kind:
            return 2
    except Exception:  # noqa: BLE001 - purely a perf heuristic
        pass
    return 1


def fused_model_forward(x1, x2, x3, weight, bias, *, tile_hw=32768):
    """x?: (N, Cin, H, W) f32; weight: (Cout, Cin, 1, 1); bias: (Cout,)."""
    N, Cin, H, W = x1.shape
    Cout = weight.shape[0]
    HW = H * W

    # Pad only to a 128-lane multiple; pick T as a divisor of HW_pad so there is
    # no over-padding (and usually no padding at all).
    HW_pad = _round_up(HW, 128)
    m = HW_pad // 128
    max_d = max(1, tile_hw // 128)
    d = 1
    for cand in range(min(m, max_d), 0, -1):
        if m % cand == 0:
            d = cand
            break
    T = 128 * d

    # Dual-TC chips (v7x): make sure there are at least 2 "parallel" grid steps.
    num_tc = _num_tensorcores_per_chip()
    while N * (HW_pad // T) < num_tc and T % 256 == 0:
        T //= 2

    def prep(x):
        r = x.reshape(N, Cin, HW)                    # pure reshape, no transpose
        if HW_pad != HW:
            r = jnp.pad(r, ((0, 0), (0, 0), (0, HW_pad - HW)))
        return r

    r1, r2, r3 = prep(x1), prep(x2), prep(x3)
    w2 = weight.reshape(Cout, Cin).astype(jnp.float32)           # (Cout, Cin)
    b3 = (3.0 * bias).reshape(Cout, 1).astype(jnp.float32)       # fold the 3x bias

    grid = (N, HW_pad // T)

    out = pl.pallas_call(
        _fused_conv1x1_sum_relu_kernel,
        out_shape=jax.ShapeDtypeStruct((N, Cout, HW_pad), jnp.float32),
        grid_spec=pltpu.PrefetchScalarGridSpec(
            num_scalar_prefetch=0,
            grid=grid,
            in_specs=[
                pl.BlockSpec((1, Cin, T), lambda n, s: (n, 0, s)),
                pl.BlockSpec((1, Cin, T), lambda n, s: (n, 0, s)),
                pl.BlockSpec((1, Cin, T), lambda n, s: (n, 0, s)),
                pl.BlockSpec((Cout, Cin), lambda n, s: (0, 0)),   # resident weight
                pl.BlockSpec((Cout, 1), lambda n, s: (0, 0)),     # resident 3*bias
            ],
            out_specs=pl.BlockSpec((1, Cout, T), lambda n, s: (n, 0, s)),
        ),
        compiler_params=pltpu.CompilerParams(
            dimension_semantics=("parallel", "parallel"),
        ),
    )(r1, r2, r3, w2, b3)

    if HW_pad != HW:
        out = out[:, :, :HW]
    return out.reshape(N, Cout, H, W)


if __name__ == "__main__":
    key = jax.random.PRNGKey(0)
    k1, k2, k3, kw, kb = jax.random.split(key, 5)

    # Shapes consistent with the module: Conv2d(3, 8, 1) on (1, 3, 64, 64).
    N, Cin, H, W = 1, 3, 64, 64
    Cout = 8

    x1 = jax.random.normal(k1, (N, Cin, H, W), dtype=jnp.float32)
    x2 = jax.random.normal(k2, (N, Cin, H, W), dtype=jnp.float32)
    x3 = jax.random.normal(k3, (N, Cin, H, W), dtype=jnp.float32)

    weight = jax.random.normal(kw, (Cout, Cin, 1, 1), dtype=jnp.float32) * 0.1
    bias = jax.random.normal(kb, (Cout,), dtype=jnp.float32) * 0.1

    out = fused_model_forward(x1, x2, x3, weight, bias)
    out = jax.block_until_ready(out)

    # Pure-JAX reference of the module semantics: relu(conv(x1)+conv(x2)+conv(x3)).
    def conv1x1(x):
        return (
            jnp.einsum("nchw,oc->nohw", x, weight.reshape(Cout, Cin),
                       precision=jax.lax.Precision.HIGHEST)
            + bias[None, :, None, None]
        )

    ref = jnp.maximum(conv1x1(x3) + (conv1x1(x1) + conv1x1(x2)), 0.0)
    assert out.shape == (N, Cout, H, W)
    assert jnp.allclose(out, ref, atol=1e-5, rtol=1e-5)

    print("KERNEL_OK")
</pallas_src>

<mosaic_0001>
module attributes {stable_mosaic.version = 11 : i64} {
  func.func @_fused_conv1x1_sum_relu_kernel(%arg0: i32, %arg1: i32, %arg2: memref<1x3x4096xf32, #tpu.memory_space<vmem>>, %arg3: memref<1x3x4096xf32, #tpu.memory_space<vmem>>, %arg4: memref<1x3x4096xf32, #tpu.memory_space<vmem>>, %arg5: memref<8x3xf32, #tpu.memory_space<vmem>>, %arg6: memref<8x1xf32, #tpu.memory_space<vmem>>, %arg7: memref<1x8x4096xf32, #tpu.memory_space<vmem>>) attributes {dimension_semantics = [#tpu.dimension_semantics<parallel>, #tpu.dimension_semantics<parallel>], iteration_bounds = array<i64: 1, 1>, scalar_prefetch = 0 : i64, scratch_operands = 0 : i64, tpu.core_type = #tpu.core_type<tc>, window_params = [{transform_indices = @transform_0, window_bounds = array<i64: 1, 3, 4096>}, {transform_indices = @transform_1, window_bounds = array<i64: 1, 3, 4096>}, {transform_indices = @transform_2, window_bounds = array<i64: 1, 3, 4096>}, {pipeline_mode = #tpu.pipeline_mode<synchronous>, transform_indices = @transform_3, window_bounds = array<i64: 8, 3>}, {pipeline_mode = #tpu.pipeline_mode<synchronous>, transform_indices = @transform_4, window_bounds = array<i64: 8, 1>}, {transform_indices = @transform_5, window_bounds = array<i64: 1, 8, 4096>}]} {
    %c0 = arith.constant 0 : index
    %c0_0 = arith.constant 0 : index
    %c0_1 = arith.constant 0 : index
    %0 = vector.load %arg2[%c0, %c0_0, %c0_1] : memref<1x3x4096xf32, #tpu.memory_space<vmem>>, vector<1x3x4096xf32>
    %1 = vector.shape_cast %0 : vector<1x3x4096xf32> to vector<3x4096xf32>
    %c0_2 = arith.constant 0 : index
    %c0_3 = arith.constant 0 : index
    %c0_4 = arith.constant 0 : index
    %2 = vector.load %arg3[%c0_2, %c0_3, %c0_4] : memref<1x3x4096xf32, #tpu.memory_space<vmem>>, vector<1x3x4096xf32>
    %3 = vector.shape_cast %2 : vector<1x3x4096xf32> to vector<3x4096xf32>
    %4 = arith.addf %1, %3 : vector<3x4096xf32>
    %c0_5 = arith.constant 0 : index
    %c0_6 = arith.constant 0 : index
    %c0_7 = arith.constant 0 : index
    %5 = vector.load %arg4[%c0_5, %c0_6, %c0_7] : memref<1x3x4096xf32, #tpu.memory_space<vmem>>, vector<1x3x4096xf32>
    %6 = vector.shape_cast %5 : vector<1x3x4096xf32> to vector<3x4096xf32>
    %7 = arith.addf %4, %6 : vector<3x4096xf32>
    %c0_8 = arith.constant 0 : index
    %c0_9 = arith.constant 0 : index
    %8 = vector.load %arg5[%c0_8, %c0_9] : memref<8x3xf32, #tpu.memory_space<vmem>>, vector<8x3xf32>
    %c0_10 = arith.constant 0 : index
    %c0_11 = arith.constant 0 : index
    %9 = vector.load %arg6[%c0_10, %c0_11] : memref<8x1xf32, #tpu.memory_space<vmem>>, vector<8x1xf32>
    %10 = vector.extract_strided_slice %8 {offsets = [0, 0], sizes = [8, 1], strides = [1, 1]} : vector<8x3xf32> to vector<8x1xf32>
    %11 = vector.extract_strided_slice %7 {offsets = [0, 0], sizes = [1, 4096], strides = [1, 1]} : vector<3x4096xf32> to vector<1x4096xf32>
    %12 = vector.broadcast %10 : vector<8x1xf32> to vector<8x4096xf32>
    %13 = vector.broadcast %11 : vector<1x4096xf32> to vector<8x4096xf32>
    %14 = arith.mulf %12, %13 : vector<8x4096xf32>
    %15 = vector.broadcast %9 : vector<8x1xf32> to vector<8x4096xf32>
    %16 = arith.addf %15, %14 : vector<8x4096xf32>
    %17 = vector.extract_strided_slice %8 {offsets = [0, 1], sizes = [8, 1], strides = [1, 1]} : vector<8x3xf32> to vector<8x1xf32>
    %18 = vector.extract_strided_slice %7 {offsets = [1, 0], sizes = [1, 4096], strides = [1, 1]} : vector<3x4096xf32> to vector<1x4096xf32>
    %19 = vector.broadcast %17 : vector<8x1xf32> to vector<8x4096xf32>
    %20 = vector.broadcast %18 : vector<1x4096xf32> to vector<8x4096xf32>
    %21 = arith.mulf %19, %20 : vector<8x4096xf32>
    %22 = arith.addf %16, %21 : vector<8x4096xf32>
    %23 = vector.extract_strided_slice %8 {offsets = [0, 2], sizes = [8, 1], strides = [1, 1]} : vector<8x3xf32> to vector<8x1xf32>
    %24 = vector.extract_strided_slice %7 {offsets = [2, 0], sizes = [1, 4096], strides = [1, 1]} : vector<3x4096xf32> to vector<1x4096xf32>
    %25 = vector.broadcast %23 : vector<8x1xf32> to vector<8x4096xf32>
    %26 = vector.broadcast %24 : vector<1x4096xf32> to vector<8x4096xf32>
    %27 = arith.mulf %25, %26 : vector<8x4096xf32>
    %28 = arith.addf %22, %27 : vector<8x4096xf32>
    %cst = arith.constant 0.000000e+00 : f32
    %29 = vector.broadcast %cst : f32 to vector<8x4096xf32>
    %30 = arith.maximumf %28, %29 : vector<8x4096xf32>
    %c0_12 = arith.constant 0 : index
    %c0_13 = arith.constant 0 : index
    %c0_14 = arith.constant 0 : index
    %31 = vector.load %arg7[%c0_12, %c0_13, %c0_14] : memref<1x8x4096xf32, #tpu.memory_space<vmem>>, vector<1x8x4096xf32>
    %32 = vector.shape_cast %31 : vector<1x8x4096xf32> to vector<8x4096xf32>
    %33 = vector.shape_cast %30 : vector<8x4096xf32> to vector<1x8x4096xf32>
    tpu.vector_store %arg7[%c0_12, %c0_13, %c0_14], %33 {strides = array<i32>} : memref<1x8x4096xf32, #tpu.memory_space<vmem>>, vector<1x8x4096xf32>,
    return
  }
  func.func @transform_0(%arg0: i32, %arg1: i32) -> (i32, i32, i32) {
    %c0_i32 = arith.constant 0 : i32
    %c0_i32_0 = arith.constant 0 : i32
    return %arg0, %c0_i32, %arg1 : i32, i32, i32
  }
  func.func @transform_1(%arg0: i32, %arg1: i32) -> (i32, i32, i32) {
    %c0_i32 = arith.constant 0 : i32
    %c0_i32_0 = arith.constant 0 : i32
    return %arg0, %c0_i32, %arg1 : i32, i32, i32
  }
  func.func @transform_2(%arg0: i32, %arg1: i32) -> (i32, i32, i32) {
    %c0_i32 = arith.constant 0 : i32
    %c0_i32_0 = arith.constant 0 : i32
    return %arg0, %c0_i32, %arg1 : i32, i32, i32
  }
  func.func @transform_3(%arg0: i32, %arg1: i32) -> (i32, i32) {
    %c0_i32 = arith.constant 0 : i32
    %c0_i32_0 = arith.constant 0 : i32
    %c0_i32_1 = arith.constant 0 : i32
    return %c0_i32, %c0_i32_0 : i32, i32
  }
  func.func @transform_4(%arg0: i32, %arg1: i32) -> (i32, i32) {
    %c0_i32 = arith.constant 0 : i32
    %c0_i32_0 = arith.constant 0 : i32
    %c0_i32_1 = arith.constant 0 : i32
    return %c0_i32, %c0_i32_0 : i32, i32
  }
  func.func @transform_5(%arg0: i32, %arg1: i32) -> (i32, i32, i32) {
    %c0_i32 = arith.constant 0 : i32
    %c0_i32_0 = arith.constant 0 : i32
    return %arg0, %c0_i32, %arg1 : i32, i32, i32
  }
}

</mosaic_0001>

<bundles_post_ra>
// kernel: tpu_custom_call.1
= control target key start
LH: loop header
LB: loop body
LE: loop exit
PB: predicated region body
PF: predicated region fallthrough
CT: control target
= control target key end

     0   :  { %v731_v1 = vmov 0   ;;  %v732_v2 = vmov 1   ;;  %s1461_s0 = inlined_call_operand.vmem [shape: f32[1,3,4096], index: 0, kind: input, shape index: {}]   ;;  %s1462_s1 = inlined_call_operand.vmem [shape: f32[1,3,4096], index: 1, kind: input, shape index: {}]   ;;  %s1463_s2 = inlined_call_operand.vmem [shape: f32[1,3,4096], index: 2, kind: input, shape index: {}]   ;;  %s1464_s3 = inlined_call_operand.vmem [shape: f32[8,3], index: 3, kind: input, shape index: {}]   ;;  %s1465_s4 = inlined_call_operand.vmem [shape: f32[8,1], index: 4, kind: input, shape index: {}]   ;;  %s1466_s5 = inlined_call_operand.hbm [shape: f32[1,8,4096], index: 5, kind: output, shape index: {}]  }
   0x1   :  { %v101_v0 = vld [vmem:[%s1464_s3] sm:$0xff]  ;;  %701 = vset.pattern.permute.xlu0 %v731_v1  ;;  %702 = vset.pattern.permute.xlu1 %v732_v2 }
   0x2   :  { %10 = vsyncpa [#allocation3], 0  ;;  %105 = vperm.xlu0 %701, %v101_v0   ;;  %290 = vperm.xlu1 %702, %v101_v0   ;;  %v102_v3 = vld [vmem:[%s1465_s4] sm:$0xff]  ;;  %v733_v4 = vmov 2   ;;  %v22_v6 = vld [vmem:[%s1461_s0 + $0x8] sm:$0x77] }
   0x3   :  { %v21_v5 = vld [vmem:[%s1461_s0] sm:$0x77]  ;;  %v23_v7 = vld [vmem:[%s1461_s0 + $0x10] sm:$0x77]  ;;  %v24_v8 = vld [vmem:[%s1461_s0 + $0x18] sm:$0x77] }
   0x4   :  { %v37_v9 = vld [vmem:[%s1462_s1] sm:$0x77]  ;;  %v38_v10 = vld [vmem:[%s1462_s1 + $0x8] sm:$0x77]  ;;  %v39_v11 = vld [vmem:[%s1462_s1 + $0x10] sm:$0x77] }
   0x5   :  { %v40_v12 = vld [vmem:[%s1462_s1 + $0x18] sm:$0x77]  ;;  %v25_v13 = vld [vmem:[%s1461_s0 + $0x20] sm:$0x77]  ;;  %v26_v14 = vld [vmem:[%s1461_s0 + $0x28] sm:$0x77]  ;;  %v53_v38 = vadd.f32 %v37_v9, %v21_v5  ;;  %v54_v39 = vadd.f32 %v38_v10, %v22_v6  ;;  %v55_v40 = vadd.f32 %v39_v11, %v23_v7 }
   0x6   :  { %v27_v15 = vld [vmem:[%s1461_s0 + $0x30] sm:$0x77]  ;;  %v28_v16 = vld [vmem:[%s1461_s0 + $0x38] sm:$0x77]  ;;  %v41_v17 = vld [vmem:[%s1462_s1 + $0x20] sm:$0x77]  ;;  %v56_v41 = vadd.f32 %v40_v12, %v24_v8 }
   0x7   :  { %v42_v18 = vld [vmem:[%s1462_s1 + $0x28] sm:$0x77]  ;;  %v43_v19 = vld [vmem:[%s1462_s1 + $0x30] sm:$0x77]  ;;  %v44_v20 = vld [vmem:[%s1462_s1 + $0x38] sm:$0x77]  ;;  %v57_v45 = vadd.f32 %v41_v17, %v25_v13 }
   0x8   :  { %v29_v21 = vld [vmem:[%s1461_s0 + $0x40] sm:$0x77]  ;;  %v30_v22 = vld [vmem:[%s1461_s0 + $0x48] sm:$0x77]  ;;  %v31_v23 = vld [vmem:[%s1461_s0 + $0x50] sm:$0x77]  ;;  %v58_v46 = vadd.f32 %v42_v18, %v26_v14  ;;  %v59_v47 = vadd.f32 %v43_v19, %v27_v15  ;;  %v60_v48 = vadd.f32 %v44_v20, %v28_v16 }
   0x9   :  { %v32_v24 = vld [vmem:[%s1461_s0 + $0x58] sm:$0x77]  ;;  %v45_v25 = vld [vmem:[%s1462_s1 + $0x40] sm:$0x77]  ;;  %v46_v26 = vld [vmem:[%s1462_s1 + $0x48] sm:$0x77] }
   0xa   :  { %254 = vperm.xlu0 %701, %v102_v3   ;;  %703 = vset.pattern.permute.xlu1 %v733_v4  ;;  %v47_v27 = vld [vmem:[%s1462_s1 + $0x50] sm:$0x77]  ;;  %v33_v28 = vld [vmem:[%s1461_s0 + $0x60] sm:$0x77]  ;;  %v34_v29 = vld [vmem:[%s1461_s0 + $0x68] sm:$0x77]  ;;  %v61_v52 = vadd.f32 %v45_v25, %v29_v21  ;;  %v62_v53 = vadd.f32 %v46_v26, %v30_v22 }
   0xb   :  { %454 = vperm.xlu1 %703, %v101_v0   ;;  %v35_v30 = vld [vmem:[%s1461_s0 + $0x70] sm:$0x77]  ;;  %v36_v31 = vld [vmem:[%s1461_s0 + $0x78] sm:$0x77]  ;;  %v49_v33 = vld [vmem:[%s1462_s1 + $0x60] sm:$0x77]  ;;  %v63_v54 = vadd.f32 %v47_v27, %v31_v23 }
   0xc   :  { %v48_v32 = vld [vmem:[%s1462_s1 + $0x58] sm:$0x77]  ;;  %v50_v34 = vld [vmem:[%s1462_s1 + $0x68] sm:$0x77]  ;;  %v51_v35 = vld [vmem:[%s1462_s1 + $0x70] sm:$0x77]  ;;  %v65_v59 = vadd.f32 %v49_v33, %v33_v28 }
   0xd   :  { %v52_v36 = vld [vmem:[%s1462_s1 + $0x78] sm:$0x77]  ;;  %v69_v37 = vld [vmem:[%s1463_s2] sm:$0x77]  ;;  %v70_v42 = vld [vmem:[%s1463_s2 + $0x8] sm:$0x77]  ;;  %v64_v55 = vadd.f32 %v48_v32, %v32_v24  ;;  %v66_v60 = vadd.f32 %v50_v34, %v34_v29  ;;  %v67_v61 = vadd.f32 %v51_v35, %v35_v30 }
   0xe   :  { %v71_v43 = vld [vmem:[%s1463_s2 + $0x10] sm:$0x77]  ;;  %v72_v44 = vld [vmem:[%s1463_s2 + $0x18] sm:$0x77]  ;;  %v73_v49 = vld [vmem:[%s1463_s2 + $0x20] sm:$0x77]  ;;  %v68_v62 = vadd.f32 %v52_v36, %v36_v31  ;;  %v915_v5 = vadd.f32 %v69_v37, %v53_v38  ;;  %v917_v6 = vadd.f32 %v70_v42, %v54_v39 }
   0xf   :  { %v74_v50 = vld [vmem:[%s1463_s2 + $0x28] sm:$0x77]  ;;  %v75_v51 = vld [vmem:[%s1463_s2 + $0x30] sm:$0x77]  ;;  %v76_v56 = vld [vmem:[%s1463_s2 + $0x38] sm:$0x77]  ;;  %v919_v7 = vadd.f32 %v71_v43, %v55_v40  ;;  %v921_v8 = vadd.f32 %v72_v44, %v56_v41  ;;  %v923_v9 = vadd.f32 %v73_v49, %v57_v45 }
  0x10   :  { %v77_v57 = vld [vmem:[%s1463_s2 + $0x40] sm:$0x77]  ;;  %v78_v58 = vld [vmem:[%s1463_s2 + $0x48] sm:$0x77]  ;;  %v79_v63 = vld [vmem:[%s1463_s2 + $0x50] sm:$0x77]  ;;  %v925_v10 = vadd.f32 %v74_v50, %v58_v46  ;;  %v927_v11 = vadd.f32 %v75_v51, %v59_v47  ;;  %v929_v12 = vadd.f32 %v76_v56, %v60_v48 }
  0x11   :  { %v80_v0 = vld [vmem:[%s1463_s2 + $0x58] sm:$0x77]  ;;  %v81_v1 = vld [vmem:[%s1463_s2 + $0x60] sm:$0x77]  ;;  %v82_v2 = vld [vmem:[%s1463_s2 + $0x68] sm:$0x77]  ;;  %v931_v13 = vadd.f32 %v77_v57, %v61_v52  ;;  %v933_v14 = vadd.f32 %v78_v58, %v62_v53  ;;  %v935_v15 = vadd.f32 %v79_v63, %v63_v54 }
  0x12   :  { %704 = vset.pattern.permute.xlu0 %v733_v4  ;;  %v83_v3 = vld [vmem:[%s1463_s2 + $0x70] sm:$0x77]  ;;  %v84_v4 = vld [vmem:[%s1463_s2 + $0x78] sm:$0x77]  ;;  %1499 = vst [vmem:[#allocation5_spill] sm:$0xff] %v915_v5  ;;  %v937_v16 = vadd.f32 %v80_v0, %v64_v55  ;;  %v939_v17 = vadd.f32 %v81_v1, %v65_v59  ;;  %v941_v18 = vadd.f32 %v82_v2, %v66_v60  ;;  %v124_v21 = vperm.slane %v915_v5, 0 }
  0x13   :  { %1500 = vst [vmem:[#allocation6_spill] sm:$0xff] %v917_v6  ;;  %v943_v19 = vadd.f32 %v83_v3, %v67_v61  ;;  %v945_v20 = vadd.f32 %v84_v4, %v68_v62  ;;  %v125_v22 = vperm.slane %v915_v5, 4  ;;  %v126_v23 = vperm.slane %v917_v6, 0  ;;  %s734_s2 = smov [#allocation2]   ;;  %s688_s10 = sshll.u32 %s1466_s5, 4  ;;  %s689_s10 = int_to_ptr.hbm [resolvable:$true] %s688_s10 }
  0x14   :  { %1501 = vst [vmem:[#allocation7_spill] sm:$0xff] %v919_v7  ;;  %v127_v24 = vperm.slane %v917_v6, 4  ;;  %v128_v25 = vperm.slane %v919_v7, 0  ;;  %v129_v26 = vperm.slane %v919_v7, 4  ;;  %v130_v27 = vperm.slane %v921_v8, 0  ;;  %s686_s7 = sshll.u32 %s734_s2, 4  ;;  %s687_s7 = int_to_ptr.vmem [resolvable:$true] %s686_s7 }
  0x15   :  { %1502 = vst [vmem:[#allocation8_spill] sm:$0xff] %v921_v8  ;;  %v131_v28 = vperm.slane %v921_v8, 4  ;;  %v132_v29 = vperm.slane %v923_v9, 0  ;;  %v133_v30 = vperm.slane %v923_v9, 4  ;;  %v134_v31 = vperm.slane %v925_v10, 0 }
  0x16   :  { %1503 = vst [vmem:[#allocation9_spill] sm:$0xff] %v923_v9  ;;  %v135_v32 = vperm.slane %v925_v10, 4  ;;  %v136_v33 = vperm.slane %v927_v11, 0  ;;  %v137_v34 = vperm.slane %v927_v11, 4  ;;  %v138_v35 = vperm.slane %v929_v12, 0 }
  0x17   :  { %1504 = vst [vmem:[#allocation10_spill] sm:$0xff] %v925_v10  ;;  %v139_v36 = vperm.slane %v929_v12, 4  ;;  %v140_v37 = vperm.slane %v931_v13, 0  ;;  %v141_v38 = vperm.slane %v931_v13, 4  ;;  %v142_v39 = vperm.slane %v933_v14, 0 }
  0x18   :  { %1505 = vst [vmem:[#allocation11_spill] sm:$0xff] %v927_v11  ;;  %v143_v40 = vperm.slane %v933_v14, 4  ;;  %v144_v41 = vperm.slane %v935_v15, 0  ;;  %v145_v42 = vperm.slane %v935_v15, 4  ;;  %v146_v43 = vperm.slane %v937_v16, 0 }
  0x19   :  { %1506 = vst [vmem:[#allocation12_spill] sm:$0xff] %v929_v12  ;;  %v147_v44 = vperm.slane %v937_v16, 4  ;;  %v148_v45 = vperm.slane %v939_v17, 0  ;;  %v149_v46 = vperm.slane %v939_v17, 4  ;;  %v150_v47 = vperm.slane %v941_v18, 0 }
  0x1a   :  { %1507 = vst [vmem:[#allocation13_spill] sm:$0xff] %v931_v13  ;;  %v151_v48 = vperm.slane %v941_v18, 4  ;;  %v152_v49 = vperm.slane %v943_v19, 0  ;;  %v153_v50 = vperm.slane %v943_v19, 4  ;;  %v154_v51 = vperm.slane %v945_v20, 0 }
  0x1b   :  { %1508 = vst [vmem:[#allocation14_spill] sm:$0xff] %v933_v14  ;;  %v155_v52 = vperm.slane %v945_v20, 4  ;;  %v979_v53 = vperm.slane %v124_v21, 0  ;;  %v981_v54 = vperm.slane %v125_v22, 0  ;;  %v983_v55 = vperm.slane %v126_v23, 0 }
  0x1c   :  { %1509 = vst [vmem:[#allocation15_spill] sm:$0xff] %v935_v15  ;;  %v985_v56 = vperm.slane %v127_v24, 0  ;;  %v987_v57 = vperm.slane %v128_v25, 0  ;;  %v989_v58 = vperm.slane %v129_v26, 0  ;;  %v991_v59 = vperm.slane %v130_v27, 0 }
  0x1d   :  { %1510 = vst [vmem:[#allocation16_spill] sm:$0xff] %v937_v16  ;;  %v993_v60 = vperm.slane %v131_v28, 0  ;;  %v995_v61 = vperm.slane %v132_v29, 0  ;;  %v997_v62 = vperm.slane %v133_v30, 0  ;;  %v999_v63 = vperm.slane %v134_v31, 0 }
  0x1e   :  { %1511 = vst [vmem:[#allocation17_spill] sm:$0xff] %v939_v17  ;;  %v1001_v0 = vperm.slane %v135_v32, 0  ;;  %v1003_v1 = vperm.slane %v136_v33, 0  ;;  %v1005_v2 = vperm.slane %v137_v34, 0  ;;  %v1007_v3 = vperm.slane %v138_v35, 0 }
  0x1f   :  { %1512 = vst [vmem:[#allocation18_spill] sm:$0xff] %v941_v18  ;;  %v1009_v4 = vperm.slane %v139_v36, 0  ;;  %v1011_v21 = vperm.slane %v140_v37, 0  ;;  %v1013_v22 = vperm.slane %v141_v38, 0  ;;  %v1015_v23 = vperm.slane %v142_v39, 0 }
  0x20   :  { %1513 = vst [vmem:[#allocation19_spill] sm:$0xff] %v943_v19  ;;  %v1017_v24 = vperm.slane %v143_v40, 0  ;;  %v1019_v25 = vperm.slane %v144_v41, 0  ;;  %v1021_v26 = vperm.slane %v145_v42, 0  ;;  %v1023_v27 = vperm.slane %v146_v43, 0 }
  0x21   :  { %1514 = vst [vmem:[#allocation20_spill] sm:$0xff] %v945_v20  ;;  %v1025_v28 = vperm.slane %v147_v44, 0  ;;  %v1027_v29 = vperm.slane %v148_v45, 0  ;;  %v1029_v30 = vperm.slane %v149_v46, 0  ;;  %v1031_v31 = vperm.slane %v150_v47, 0 }
  0x22   :  { %v1033_v32 = vperm.slane %v151_v48, 0  ;;  %v1035_v33 = vperm.slane %v152_v49, 0  ;;  %v1037_v34 = vperm.slane %v153_v50, 0  ;;  %v1039_v35 = vperm.slane %v154_v51, 0 }
  0x23   :  { %v1041_v36 = vperm.slane %v155_v52, 0  ;;  %v293_v37 = vperm.slane %v915_v5, 1  ;;  %v294_v38 = vperm.slane %v915_v5, 5  ;;  %v295_v39 = vperm.slane %v917_v6, 1 }
  0x25   :  { %v1078_v41 = vperm.slane %v293_v37, 1 }
  0x74   :  { %v106_v49 = vpop.permute.xlu0 %105 }
  0x75   :  { %v220_v50 = vmul.f32 %v979_v53, %v106_v49  ;;  %v221_v51 = vmul.f32 %v981_v54, %v106_v49  ;;  %v222_v52 = vmul.f32 %v983_v55, %v106_v49  ;;  %v223_v43 = vmul.f32 %v985_v56, %v106_v49 }
  0x76   :  { %v224_v44 = vmul.f32 %v987_v57, %v106_v49  ;;  %v225_v45 = vmul.f32 %v989_v58, %v106_v49  ;;  %v226_v46 = vmul.f32 %v991_v59, %v106_v49  ;;  %v227_v47 = vmul.f32 %v993_v60, %v106_v49 }
  0x77   :  { %v228_v48 = vmul.f32 %v995_v61, %v106_v49  ;;  %v229_v53 = vmul.f32 %v997_v62, %v106_v49  ;;  %v230_v54 = vmul.f32 %v999_v63, %v106_v49  ;;  %v231_v55 = vmul.f32 %v1001_v0, %v106_v49 }
  0x78   :  { %v232_v37 = vmul.f32 %v1003_v1, %v106_v49  ;;  %v233_v56 = vmul.f32 %v1005_v2, %v106_v49  ;;  %v234_v57 = vmul.f32 %v1007_v3, %v106_v49  ;;  %v235_v58 = vmul.f32 %v1009_v4, %v106_v49 }
  0x79   :  { %v236_v59 = vmul.f32 %v1011_v21, %v106_v49  ;;  %v237_v60 = vmul.f32 %v1013_v22, %v106_v49  ;;  %v238_v61 = vmul.f32 %v1015_v23, %v106_v49  ;;  %v239_v62 = vmul.f32 %v1017_v24, %v106_v49 }
  0x7a   :  { %v240_v63 = vmul.f32 %v1019_v25, %v106_v49  ;;  %v241_v0 = vmul.f32 %v1021_v26, %v106_v49  ;;  %v242_v1 = vmul.f32 %v1023_v27, %v106_v49  ;;  %v243_v2 = vmul.f32 %v1025_v28, %v106_v49 }
  0x7b   :  { %v244_v3 = vmul.f32 %v1027_v29, %v106_v49  ;;  %v245_v4 = vmul.f32 %v1029_v30, %v106_v49  ;;  %v246_v21 = vmul.f32 %v1031_v31, %v106_v49  ;;  %v247_v22 = vmul.f32 %v1033_v32, %v106_v49 }
  0x7c   :  { %v255_v42 = vpop.permute.xlu0 %254  ;;  %v248_v23 = vmul.f32 %v1035_v33, %v106_v49  ;;  %v249_v24 = vmul.f32 %v1037_v34, %v106_v49  ;;  %v250_v25 = vmul.f32 %v1039_v35, %v106_v49  ;;  %v251_v26 = vmul.f32 %v1041_v36, %v106_v49 }
  0x7d   :  { %v1109_v40 = vadd.f32 %v255_v42, %v220_v50  ;;  %v1111_v27 = vadd.f32 %v255_v42, %v221_v51  ;;  %v1113_v28 = vadd.f32 %v255_v42, %v222_v52  ;;  %v1115_v29 = vadd.f32 %v255_v42, %v223_v43 }
  0x7e   :  { %v1117_v30 = vadd.f32 %v255_v42, %v224_v44  ;;  %v1119_v31 = vadd.f32 %v255_v42, %v225_v45  ;;  %v1121_v32 = vadd.f32 %v255_v42, %v226_v46  ;;  %v1123_v33 = vadd.f32 %v255_v42, %v227_v47 }
  0x7f   :  { %v1125_v34 = vadd.f32 %v255_v42, %v228_v48  ;;  %v1127_v35 = vadd.f32 %v255_v42, %v229_v53  ;;  %v1129_v36 = vadd.f32 %v255_v42, %v230_v54  ;;  %v1131_v49 = vadd.f32 %v255_v42, %v231_v55 }
  0x80   :  { %v1133_v50 = vadd.f32 %v255_v42, %v232_v37  ;;  %v1135_v43 = vadd.f32 %v255_v42, %v233_v56  ;;  %v1137_v44 = vadd.f32 %v255_v42, %v234_v57  ;;  %v1139_v45 = vadd.f32 %v255_v42, %v235_v58 }
  0x81   :  { %1515 = vst [vmem:[#allocation21_spill] sm:$0xff] %v1131_v49  ;;  %v1141_v46 = vadd.f32 %v255_v42, %v236_v59  ;;  %v1143_v47 = vadd.f32 %v255_v42, %v237_v60  ;;  %v1145_v48 = vadd.f32 %v255_v42, %v238_v61  ;;  %v1147_v51 = vadd.f32 %v255_v42, %v239_v62 }
  0x82   :  { %1516 = vst [vmem:[#allocation22_spill] sm:$0xff] %v1133_v50  ;;  %v1149_v52 = vadd.f32 %v255_v42, %v240_v63  ;;  %v1151_v53 = vadd.f32 %v255_v42, %v241_v0  ;;  %v1153_v54 = vadd.f32 %v255_v42, %v242_v1  ;;  %v1155_v55 = vadd.f32 %v255_v42, %v243_v2 }
  0x83   :  { %1517 = vst [vmem:[#allocation23_spill] sm:$0xff] %v1135_v43  ;;  %v1157_v37 = vadd.f32 %v255_v42, %v244_v3  ;;  %v1159_v56 = vadd.f32 %v255_v42, %v245_v4  ;;  %v1161_v57 = vadd.f32 %v255_v42, %v246_v21  ;;  %v1163_v58 = vadd.f32 %v255_v42, %v247_v22 }
  0x84   :  { %1518 = vst [vmem:[#allocation24_spill] sm:$0xff] %v1137_v44  ;;  %v1165_v59 = vadd.f32 %v255_v42, %v248_v23  ;;  %v1167_v60 = vadd.f32 %v255_v42, %v249_v24  ;;  %v1169_v61 = vadd.f32 %v255_v42, %v250_v25  ;;  %v1171_v62 = vadd.f32 %v255_v42, %v251_v26 }
  0x85   :  { %1519 = vst [vmem:[#allocation25_spill] sm:$0xff] %v1139_v45  ;;  %v358_v63 = vperm.slane %v294_v38, 1  ;;  %v359_v0 = vperm.slane %v295_v39, 1  ;;  %v1536_v1 = vperm.slane %v917_v6, 5  ;;  %v1537_v3 = vperm.slane %v919_v7, 1 }
  0x86   :  { %1520 = vst [vmem:[#allocation26_spill] sm:$0xff] %v1141_v46  ;;  %v1538_v21 = vperm.slane %v919_v7, 5  ;;  %v1539_v23 = vperm.slane %v921_v8, 1  ;;  %v1540_v42 = vperm.slane %v921_v8, 5  ;;  %v1541_v38 = vperm.slane %v923_v9, 1 }
  0x87   :  { %1521 = vst [vmem:[#allocation27_spill] sm:$0xff] %v1143_v47  ;;  %v360_v2 = vperm.slane %v1536_v1, 1  ;;  %v361_v4 = vperm.slane %v1537_v3, 1  ;;  %v1542_v39 = vperm.slane %v923_v9, 5  ;;  %v1543_v1 = vperm.slane %v925_v10, 1 }
  0x88   :  { %1522 = vst [vmem:[#allocation28_spill] sm:$0xff] %v1145_v48  ;;  %v362_v22 = vperm.slane %v1538_v21, 1  ;;  %v363_v24 = vperm.slane %v1539_v23, 1  ;;  %v364_v25 = vperm.slane %v1540_v42, 1  ;;  %v365_v26 = vperm.slane %v1541_v38, 1 }
  0x89   :  { %1523 = vst [vmem:[#allocation29_spill] sm:$0xff] %v1147_v51  ;;  %v1544_v3 = vperm.slane %v925_v10, 5  ;;  %v1545_v21 = vperm.slane %v927_v11, 1  ;;  %v1546_v23 = vperm.slane %v927_v11, 5  ;;  %v1547_v42 = vperm.slane %v929_v12, 1  ;;  %v291_v11 = vpop.permute.xlu1 %290 }
  0x8a   :  { %1524 = vst [vmem:[#allocation30_spill] sm:$0xff] %v1149_v52  ;;  %v1548_v38 = vperm.slane %v929_v12, 5  ;;  %v391_v51 = vmul.f32 %v359_v0, %v291_v11  ;;  %v393_v48 = vmul.f32 %v361_v4, %v291_v11  ;;  %v396_v47 = vmul.f32 %v364_v25, %v291_v11 }
  0x8b   :  { %1525 = vst [vmem:[#allocation31_spill] sm:$0xff] %v1151_v53  ;;  %v370_v7 = vperm.slane %v1546_v23, 1  ;;  %v371_v8 = vperm.slane %v1547_v42, 1  ;;  %v1553_v23 = vperm.slane %v935_v15, 1  ;;  %v1554_v42 = vperm.slane %v935_v15, 5 }
  0x8c   :  { %1526 = vst [vmem:[#allocation32_spill] sm:$0xff] %v1153_v54  ;;  %v372_v6 = vperm.slane %v1548_v38, 1  ;;  %v1555_v38 = vperm.slane %v937_v16, 1  ;;  %v397_v46 = vmul.f32 %v365_v26, %v291_v11 }
  0x8d   :  { %1527 = vst [vmem:[#allocation33_spill] sm:$0xff] %v1155_v55  ;;  %v378_v12 = vperm.slane %v1554_v42, 1  ;;  %v1561_v42 = vperm.slane %v943_v19, 1  ;;  %v402_v44 = vmul.f32 %v370_v7, %v291_v11  ;;  %v403_v43 = vmul.f32 %v371_v8, %v291_v11 }
  0x8e   :  { %1528 = vst [vmem:[#allocation34_spill] sm:$0xff] %v1157_v37  ;;  %v1251_v8 = vadd.f32 %v391_v51, %v1113_v28  ;;  %v1570_v28 = vld [vmem:[#allocation23_spill] sm:$0xff] }
  0x8f   :  { %1529 = vst [vmem:[#allocation35_spill] sm:$0xff] %v1159_v56  ;;  %v379_v56 = vperm.slane %v1555_v38, 1  ;;  %v385_v15 = vperm.slane %v1561_v42, 1  ;;  %v1562_v38 = vperm.slane %v943_v19, 5 }
  0x90   :  { %1530 = vst [vmem:[#allocation36_spill] sm:$0xff] %v1161_v57  ;;  %v377_v57 = vperm.slane %v1553_v23, 1  ;;  %v1560_v23 = vperm.slane %v941_v18, 5 }
  0x91   :  { %1531 = vst [vmem:[#allocation37_spill] sm:$0xff] %v1163_v58  ;;  %v386_v53 = vperm.slane %v1562_v38, 1  ;;  %v411_v0 = vmul.f32 %v379_v56, %v291_v11  ;;  %v1236_v26 = vmul.f32 %v385_v15, %v291_v11 }
  0x92   :  { %1532 = vst [vmem:[#allocation38_spill] sm:$0xff] %v1165_v59  ;;  %v369_v59 = vperm.slane %v1545_v21, 1  ;;  %v1552_v21 = vperm.slane %v933_v14, 5  ;;  %v384_v54 = vperm.slane %v1560_v23, 1  ;;  %v395_v23 = vmul.f32 %v363_v24, %v291_v11 }
  0x93   :  { %1533 = vst [vmem:[#allocation39_spill] sm:$0xff] %v1167_v60  ;;  %v368_v60 = vperm.slane %v1544_v3, 1  ;;  %v1551_v3 = vperm.slane %v933_v14, 1 }
  0x94   :  { %1534 = vst [vmem:[#allocation40_spill] sm:$0xff] %v1169_v61  ;;  %v367_v61 = vperm.slane %v1543_v1, 1  ;;  %v1550_v1 = vperm.slane %v931_v13, 5  ;;  %v376_v58 = vperm.slane %v1552_v21, 1  ;;  %v1559_v21 = vperm.slane %v941_v18, 1 }
  0x95   :  { %1535 = vst [vmem:[#allocation41_spill] sm:$0xff] %v1171_v62  ;;  %v366_v62 = vperm.slane %v1542_v39, 1  ;;  %v1549_v39 = vperm.slane %v931_v13, 1  ;;  %v375_v10 = vperm.slane %v1551_v3, 1  ;;  %v1558_v3 = vperm.slane %v939_v17, 5 }
  0x96   :  { %v374_v5 = vperm.slane %v1550_v1, 1  ;;  %v1557_v1 = vperm.slane %v939_v17, 1  ;;  %v383_v55 = vperm.slane %v1559_v21, 1  ;;  %v390_v17 = vmul.f32 %v358_v63, %v291_v11  ;;  %v1583_v56 = vld [vmem:[#allocation35_spill] sm:$0xff] }
  0x97   :  { %v373_v9 = vperm.slane %v1549_v39, 1  ;;  %v1556_v39 = vperm.slane %v937_v16, 5  ;;  %v382_v14 = vperm.slane %v1558_v3, 1  ;;  %v389_v3 = vmul.f32 %v1078_v41, %v291_v11 }
  0x98   :  { %v381_v37 = vperm.slane %v1557_v1, 1  ;;  %v1564_v1 = vperm.slane %v945_v20, 5  ;;  %v392_v21 = vmul.f32 %v360_v2, %v291_v11  ;;  %v394_v18 = vmul.f32 %v362_v22, %v291_v11 }
  0x99   :  { %v380_v13 = vperm.slane %v1556_v39, 1  ;;  %v1563_v39 = vperm.slane %v945_v20, 1  ;;  %v398_v42 = vmul.f32 %v366_v62, %v291_v11  ;;  %v399_v45 = vmul.f32 %v367_v61, %v291_v11 }
  0x9a   :  { %v388_v52 = vperm.slane %v1564_v1, 1  ;;  %v400_v19 = vmul.f32 %v368_v60, %v291_v11  ;;  %v401_v38 = vmul.f32 %v369_v59, %v291_v11  ;;  %v405_v50 = vmul.f32 %v373_v9, %v291_v11  ;;  %v1587_v60 = vld [vmem:[#allocation37_spill] sm:$0xff] }
  0x9b   :  { %v387_v16 = vperm.slane %v1563_v39, 1  ;;  %v404_v39 = vmul.f32 %v372_v6, %v291_v11  ;;  %v406_v20 = vmul.f32 %v374_v5, %v291_v11  ;;  %v407_v1 = vmul.f32 %v375_v10, %v291_v11 }
  0x9c   :  { %v408_v49 = vmul.f32 %v376_v58, %v291_v11  ;;  %v409_v41 = vmul.f32 %v377_v57, %v291_v11  ;;  %v410_v63 = vmul.f32 %v378_v12, %v291_v11  ;;  %v412_v2 = vmul.f32 %v380_v13, %v291_v11 }
  0x9d   :  { %v413_v4 = vmul.f32 %v381_v37, %v291_v11  ;;  %v414_v22 = vmul.f32 %v382_v14, %v291_v11  ;;  %v415_v24 = vmul.f32 %v383_v55, %v291_v11  ;;  %v416_v25 = vmul.f32 %v384_v54, %v291_v11 }
  0x9e   :  { %v1238_v61 = vmul.f32 %v386_v53, %v291_v11  ;;  %v1240_v59 = vmul.f32 %v387_v16, %v291_v11  ;;  %v1242_v7 = vmul.f32 %v388_v52, %v291_v11  ;;  %v1245_v5 = vadd.f32 %v389_v3, %v1109_v40  ;;  %v1579_v53 = vld [vmem:[#allocation32_spill] sm:$0xff]  ;;  %v1589_v3 = vld [vmem:[#allocation5_spill] sm:$0xff] }
  0x9f   :  { %v1248_v6 = vadd.f32 %v390_v17, %v1111_v27  ;;  %v1254_v9 = vadd.f32 %v392_v21, %v1115_v29  ;;  %v1257_v10 = vadd.f32 %v393_v48, %v1117_v30  ;;  %v1260_v12 = vadd.f32 %v394_v18, %v1119_v31  ;;  %v1568_v17 = vld [vmem:[#allocation21_spill] sm:$0xff]  ;;  %v1569_v18 = vld [vmem:[#allocation22_spill] sm:$0xff]  ;;  %v1571_v30 = vld [vmem:[#allocation24_spill] sm:$0xff] }
  0xa0   :  { %1565 = vst [vmem:[#allocation42_spill] sm:$0xff] %v1238_v61  ;;  %v1263_v11 = vadd.f32 %v395_v23, %v1121_v32  ;;  %v1266_v13 = vadd.f32 %v396_v47, %v1123_v33  ;;  %v1269_v14 = vadd.f32 %v397_v46, %v1125_v34  ;;  %v1272_v15 = vadd.f32 %v398_v42, %v1127_v35  ;;  %v1572_v32 = vld [vmem:[#allocation25_spill] sm:$0xff]  ;;  %v1573_v34 = vld [vmem:[#allocation26_spill] sm:$0xff] }
  0xa1   :  { %1566 = vst [vmem:[#allocation43_spill] sm:$0xff] %v1240_v59  ;;  %v1275_v16 = vadd.f32 %v399_v45, %v1129_v36  ;;  %v1278_v40 = vadd.f32 %v400_v19, %v1568_v17  ;;  %v1281_v27 = vadd.f32 %v401_v38, %v1569_v18  ;;  %v1284_v29 = vadd.f32 %v402_v44, %v1570_v28  ;;  %v1574_v36 = vld [vmem:[#allocation27_spill] sm:$0xff]  ;;  %v1575_v19 = vld [vmem:[#allocation28_spill] sm:$0xff]  ;;  %v1576_v47 = vld [vmem:[#allocation29_spill] sm:$0xff] }
  0xa2   :  { %1567 = vst [vmem:[#allocation44_spill] sm:$0xff] %v1242_v7  ;;  %v1287_v31 = vadd.f32 %v403_v43, %v1571_v30  ;;  %v1290_v33 = vadd.f32 %v404_v39, %v1572_v32  ;;  %v1293_v35 = vadd.f32 %v405_v50, %v1573_v34  ;;  %v1296_v45 = vadd.f32 %v406_v20, %v1574_v36  ;;  %v1577_v44 = vld [vmem:[#allocation30_spill] sm:$0xff]  ;;  %v1578_v43 = vld [vmem:[#allocation31_spill] sm:$0xff]  ;;  %v1580_v50 = vld [vmem:[#allocation33_spill] sm:$0xff] }
  0xa3   :  { %v1299_v46 = vadd.f32 %v407_v1, %v1575_v19  ;;  %v1302_v48 = vadd.f32 %v408_v49, %v1576_v47  ;;  %v1305_v51 = vadd.f32 %v409_v41, %v1577_v44  ;;  %v1308_v52 = vadd.f32 %v410_v63, %v1578_v43  ;;  %v1581_v20 = vld [vmem:[#allocation34_spill] sm:$0xff]  ;;  %v1585_v49 = vld [vmem:[#allocation36_spill] sm:$0xff]  ;;  %v1591_v1 = vld [vmem:[#allocation7_spill] sm:$0xff] }
  0xa4   :  { %v1311_v54 = vadd.f32 %v411_v0, %v1579_v53  ;;  %v1314_v55 = vadd.f32 %v412_v2, %v1580_v50  ;;  %v1317_v37 = vadd.f32 %v413_v4, %v1581_v20  ;;  %v1320_v57 = vadd.f32 %v414_v22, %v1583_v56  ;;  %v1590_v42 = vld [vmem:[#allocation6_spill] sm:$0xff]  ;;  %v1592_v0 = vld [vmem:[#allocation8_spill] sm:$0xff]  ;;  %v1593_v22 = vld [vmem:[#allocation9_spill] sm:$0xff] }
  0xa5   :  { %v1323_v58 = vadd.f32 %v415_v24, %v1585_v49  ;;  %v1326_v62 = vadd.f32 %v416_v25, %v1587_v60  ;;  %v457_v21 = vperm.slane %v1589_v3, 2  ;;  %v458_v23 = vperm.slane %v1589_v3, 6  ;;  %v1594_v17 = vld [vmem:[#allocation10_spill] sm:$0xff]  ;;  %v1595_v30 = vld [vmem:[#allocation11_spill] sm:$0xff]  ;;  %v1596_v36 = vld [vmem:[#allocation12_spill] sm:$0xff]  ;;  %v1347_v49 = vpop.permute.xlu1 %454 }
  0xa6   :  { %1582 = vst [vmem:[#allocation21_spill] sm:$0xff] %v1317_v37  ;;  %v459_v38 = vperm.slane %v1590_v42, 2  ;;  %v460_v39 = vperm.slane %v1590_v42, 6  ;;  %v461_v41 = vperm.slane %v1591_v1, 2  ;;  %v462_v63 = vperm.slane %v1591_v1, 6  ;;  %v1597_v44 = vld [vmem:[#allocation13_spill] sm:$0xff] }
  0xa7   :  { %1584 = vst [vmem:[#allocation22_spill] sm:$0xff] %v1320_v57  ;;  %v463_v2 = vperm.slane %v1592_v0, 2  ;;  %v464_v4 = vperm.slane %v1592_v0, 6  ;;  %v465_v24 = vperm.slane %v1593_v22, 2  ;;  %v466_v25 = vperm.slane %v1593_v22, 6  ;;  %v1598_v50 = vld [vmem:[#allocation14_spill] sm:$0xff] }
  0xa8   :  { %1586 = vst [vmem:[#allocation23_spill] sm:$0xff] %v1323_v58  ;;  %v467_v18 = vperm.slane %v1594_v17, 2  ;;  %v468_v28 = vperm.slane %v1594_v17, 6  ;;  %v469_v32 = vperm.slane %v1595_v30, 2  ;;  %v470_v34 = vperm.slane %v1595_v30, 6  ;;  %v1599_v0 = vld [vmem:[#allocation15_spill] sm:$0xff] }
  0xa9   :  { %1588 = vst [vmem:[#allocation24_spill] sm:$0xff] %v1326_v62  ;;  %v471_v19 = vperm.slane %v1596_v36, 2  ;;  %v472_v47 = vperm.slane %v1596_v36, 6  ;;  %v473_v43 = vperm.slane %v1597_v44, 2  ;;  %v474_v53 = vperm.slane %v1597_v44, 6  ;;  %v1600_v30 = vld [vmem:[#allocation16_spill] sm:$0xff] }
  0xaa   :  { %v521_v56 = vperm.slane %v457_v21, 2  ;;  %v522_v3 = vperm.slane %v458_v23, 2  ;;  %v523_v42 = vperm.slane %v459_v38, 2  ;;  %v524_v1 = vperm.slane %v460_v39, 2  ;;  %v1601_v44 = vld [vmem:[#allocation17_spill] sm:$0xff]  ;;  %v1602_v59 = vld [vmem:[#allocation18_spill] sm:$0xff] }
  0xab   :  { %v525_v62 = vperm.slane %v461_v41, 2  ;;  %v526_v20 = vperm.slane %v462_v63, 2  ;;  %v527_v38 = vperm.slane %v463_v2, 2  ;;  %v528_v22 = vperm.slane %v464_v4, 2  ;;  %v1603_v7 = vld [vmem:[#allocation19_spill] sm:$0xff]  ;;  %v1604_v57 = vld [vmem:[#allocation20_spill] sm:$0xff] }
  0xac   :  { %v553_v39 = vmul.f32 %v521_v56, %v1347_v49  ;;  %v554_v17 = vmul.f32 %v522_v3, %v1347_v49  ;;  %v555_v36 = vmul.f32 %v523_v42, %v1347_v49  ;;  %v556_v41 = vmul.f32 %v524_v1, %v1347_v49 }
  0xad   :  { %v529_v21 = vperm.slane %v465_v24, 2  ;;  %v557_v63 = vmul.f32 %v525_v62, %v1347_v49  ;;  %v488_v2 = vperm.slane %v1604_v57, 6  ;;  %v530_v23 = vperm.slane %v466_v25, 2 }
  0xae   :  { %v558_v4 = vmul.f32 %v526_v20, %v1347_v49  ;;  %v531_v56 = vperm.slane %v467_v18, 2  ;;  %v532_v3 = vperm.slane %v468_v28, 2  ;;  %v559_v42 = vmul.f32 %v527_v38, %v1347_v49 }
  0xaf   :  { %v585_v1 = vadd.f32 %v553_v39, %v1245_v5  ;;  %v560_v60 = vmul.f32 %v528_v22, %v1347_v49  ;;  %v586_v58 = vadd.f32 %v554_v17, %v1248_v6  ;;  %v587_v24 = vadd.f32 %v555_v36, %v1251_v8 }
  0xb0   :  { %v588_v62 = vadd.f32 %v556_v41, %v1254_v9  ;;  %v533_v61 = vperm.slane %v469_v32, 2  ;;  %v534_v37 = vperm.slane %v470_v34, 2  ;;  %v561_v25 = vmul.f32 %v529_v21, %v1347_v49 }
  0xb1   :  { %v589_v20 = vadd.f32 %v557_v63, %v1257_v10  ;;  %v535_v18 = vperm.slane %v471_v19, 2  ;;  %v536_v28 = vperm.slane %v472_v47, 2  ;;  %v562_v38 = vmul.f32 %v530_v23, %v1347_v49 }
  0xb2   :  { %v590_v5 = vadd.f32 %v558_v4, %v1260_v12  ;;  %v563_v22 = vmul.f32 %v531_v56, %v1347_v49  ;;  %v564_v6 = vmul.f32 %v532_v3, %v1347_v49  ;;  %v591_v8 = vadd.f32 %v559_v42, %v1263_v11 }
  0xb3   :  { %v617_v17 = vmax.f32 %v585_v1, 0.0  ;;  %v592_v9 = vadd.f32 %v560_v60, %v1266_v13  ;;  %v618_v32 = vmax.f32 %v586_v58, 0.0  ;;  %v619_v34 = vmax.f32 %v587_v24, 0.0 }
  0xb4   :  { %v620_v36 = vmax.f32 %v588_v62, 0.0  ;;  %v537_v21 = vperm.slane %v473_v43, 2  ;;  %v565_v10 = vmul.f32 %v533_v61, %v1347_v49  ;;  %v593_v19 = vadd.f32 %v561_v25, %v1269_v14 }
  0xb5   :  { %v621_v47 = vmax.f32 %v589_v20, 0.0  ;;  %649 = vst [vmem:[#allocation2] sm:$0xff] %v617_v17  ;;  %v538_v12 = vperm.slane %v474_v53, 2  ;;  %v566_v23 = vmul.f32 %v534_v37, %v1347_v49  ;;  %v594_v39 = vadd.f32 %v562_v38, %v1272_v15 }
  0xb6   :  { %v622_v41 = vmax.f32 %v590_v5, 0.0  ;;  %650 = vst [vmem:[#allocation2 + $0x8] sm:$0xff] %v618_v32  ;;  %v1605_v11 = vperm.slane %v1598_v50, 2  ;;  %v567_v58 = vmul.f32 %v535_v18, %v1347_v49  ;;  %v595_v43 = vadd.f32 %v563_v22, %v1275_v16 }
  0xb7   :  { %v623_v60 = vmax.f32 %v591_v8, 0.0  ;;  %651 = vst [vmem:[#allocation2 + $0x10] sm:$0xff] %v619_v34  ;;  %v1606_v61 = vperm.slane %v1598_v50, 6  ;;  %v568_v53 = vmul.f32 %v536_v28, %v1347_v49  ;;  %v596_v37 = vadd.f32 %v564_v6, %v1278_v40 }
  0xb8   :  { %v539_v13 = vperm.slane %v1605_v11, 2  ;;  %v624_v63 = vmax.f32 %v592_v9, 0.0  ;;  %652 = vst [vmem:[#allocation2 + $0x18] sm:$0xff] %v620_v36  ;;  %v1607_v15 = vperm.slane %v1599_v0, 2  ;;  %v569_v56 = vmul.f32 %v537_v21, %v1347_v49 }
  0xb9   :  { %v540_v14 = vperm.slane %v1606_v61, 2  ;;  %v597_v3 = vadd.f32 %v565_v10, %v1281_v27  ;;  %v625_v42 = vmax.f32 %v593_v19, 0.0  ;;  %653 = vst [vmem:[#allocation2 + $0x20] sm:$0xff] %v621_v47  ;;  %v1608_v16 = vperm.slane %v1599_v0, 6 }
  0xba   :  { %v541_v4 = vperm.slane %v1607_v15, 2  ;;  %v570_v50 = vmul.f32 %v538_v12, %v1347_v49  ;;  %v598_v24 = vadd.f32 %v566_v23, %v1284_v29  ;;  %v626_v62 = vmax.f32 %v594_v39, 0.0  ;;  %654 = vst [vmem:[#allocation2 + $0x28] sm:$0xff] %v622_v41 }
  0xbb   :  { %v542_v1 = vperm.slane %v1608_v16, 2  ;;  %v1609_v40 = vperm.slane %v1600_v30, 2  ;;  %v571_v20 = vmul.f32 %v539_v13, %v1347_v49  ;;  %v599_v18 = vadd.f32 %v567_v58, %v1287_v31  ;;  %655 = vst [vmem:[#allocation2 + $0x30] sm:$0xff] %v623_v60 }
  0xbc   :  { %v627_v28 = vmax.f32 %v595_v43, 0.0  ;;  %v1610_v27 = vperm.slane %v1600_v30, 6  ;;  %v572_v0 = vmul.f32 %v540_v14, %v1347_v49  ;;  %v600_v5 = vadd.f32 %v568_v53, %v1290_v33  ;;  %656 = vst [vmem:[#allocation2 + $0x38] sm:$0xff] %v624_v63 }
  0xbd   :  { %v543_v25 = vperm.slane %v1609_v40, 2  ;;  %v628_v22 = vmax.f32 %v596_v37, 0.0  ;;  %v1611_v29 = vperm.slane %v1601_v44, 2  ;;  %v573_v8 = vmul.f32 %v541_v4, %v1347_v49  ;;  %657 = vst [vmem:[#allocation2 + $0x40] sm:$0xff] %v625_v42  ;;  %v1619_v42 = vld [vmem:[#allocation21_spill] sm:$0xff] }
  0xbe   :  { %v544_v38 = vperm.slane %v1610_v27, 2  ;;  %v601_v17 = vadd.f32 %v569_v56, %v1293_v35  ;;  %v629_v9 = vmax.f32 %v597_v3, 0.0  ;;  %v1612_v31 = vperm.slane %v1601_v44, 6  ;;  %658 = vst [vmem:[#allocation2 + $0x48] sm:$0xff] %v626_v62 }
  0xbf   :  { %v545_v6 = vperm.slane %v1611_v29, 2  ;;  %v574_v30 = vmul.f32 %v542_v1, %v1347_v49  ;;  %v602_v34 = vadd.f32 %v570_v50, %v1296_v45  ;;  %v630_v36 = vmax.f32 %v598_v24, 0.0  ;;  %659 = vst [vmem:[#allocation2 + $0x50] sm:$0xff] %v627_v28  ;;  %v1621_v50 = vld [vmem:[#allocation42_spill] sm:$0xff]  ;;  %v1628_v29 = vld [vmem:[#allocation24_spill] sm:$0xff] }
  0xc0   :  { %v546_v32 = vperm.slane %v1612_v31, 2  ;;  %v1613_v33 = vperm.slane %v1602_v59, 2  ;;  %v575_v10 = vmul.f32 %v543_v25, %v1347_v49  ;;  %v603_v19 = vadd.f32 %v571_v20, %v1299_v46  ;;  %660 = vst [vmem:[#allocation2 + $0x58] sm:$0xff] %v628_v22  ;;  %v1624_v25 = vld [vmem:[#allocation43_spill] sm:$0xff] }
  0xc1   :  { %v631_v47 = vmax.f32 %v599_v18, 0.0  ;;  %v1614_v35 = vperm.slane %v1602_v59, 6  ;;  %v576_v44 = vmul.f32 %v544_v38, %v1347_v49  ;;  %v604_v23 = vadd.f32 %v572_v0, %v1302_v48  ;;  %661 = vst [vmem:[#allocation2 + $0x60] sm:$0xff] %v629_v9  ;;  %v1625_v18 = vld [vmem:[#allocation23_spill] sm:$0xff]  ;;  %v1626_v38 = vld [vmem:[#allocation41_spill] sm:$0xff]  ;;  %v1627_v0 = vld [vmem:[#allocation44_spill] sm:$0xff] }
  0xc2   :  { %v547_v21 = vperm.slane %v1613_v33, 2  ;;  %v632_v39 = vmax.f32 %v600_v5, 0.0  ;;  %v1615_v45 = vperm.slane %v1603_v7, 2  ;;  %v577_v11 = vmul.f32 %v545_v6, %v1347_v49  ;;  %662 = vst [vmem:[#allocation2 + $0x68] sm:$0xff] %v630_v36 }
  0xc3   :  { %v548_v12 = vperm.slane %v1614_v35, 2  ;;  %v605_v13 = vadd.f32 %v573_v8, %v1305_v51  ;;  %v633_v58 = vmax.f32 %v601_v17, 0.0  ;;  %v1616_v46 = vperm.slane %v1603_v7, 6  ;;  %663 = vst [vmem:[#allocation2 + $0x70] sm:$0xff] %v631_v47 }
  0xc4   :  { %v549_v41 = vperm.slane %v1615_v45, 2  ;;  %v578_v59 = vmul.f32 %v546_v32, %v1347_v49  ;;  %v606_v60 = vadd.f32 %v574_v30, %v1308_v52  ;;  %v634_v61 = vmax.f32 %v602_v34, 0.0  ;;  %664 = vst [vmem:[#allocation2 + $0x78] sm:$0xff] %v632_v39  ;;  %v1618_v52 = vld [vmem:[#allocation38_spill] sm:$0xff] }
  0xc5   :  { %v550_v43 = vperm.slane %v1616_v46, 2  ;;  %v1617_v48 = vperm.slane %v1604_v57, 2  ;;  %v579_v53 = vmul.f32 %v547_v21, %v1347_v49  ;;  %v607_v37 = vadd.f32 %v575_v10, %v1311_v54  ;;  %665 = vst [vmem:[#allocation2 + $0x80] sm:$0xff] %v633_v58  ;;  %v1620_v54 = vld [vmem:[#allocation39_spill] sm:$0xff] }
  0xc6   :  { %v635_v63 = vmax.f32 %v603_v19, 0.0  ;;  %v552_v51 = vperm.slane %v488_v2, 2  ;;  %v580_v7 = vmul.f32 %v548_v12, %v1347_v49  ;;  %v608_v15 = vadd.f32 %v576_v44, %v1314_v55  ;;  %v1622_v2 = vld [vmem:[#allocation22_spill] sm:$0xff]  ;;  %666 = vst [vmem:[#allocation2 + $0x88] sm:$0xff] %v634_v61  ;;  %v1623_v55 = vld [vmem:[#allocation40_spill] sm:$0xff] }
  0xc7   :  { %v551_v14 = vperm.slane %v1617_v48, 2  ;;  %v636_v4 = vmax.f32 %v604_v23, 0.0  ;;  %v449_v56 = vadd.f32 %v1236_v26, %v1618_v52  ;;  %v581_v3 = vmul.f32 %v549_v41, %v1347_v49 }
  0xc8   :  { %v609_v16 = vadd.f32 %v577_v11, %v1619_v42  ;;  %v637_v1 = vmax.f32 %v605_v13, 0.0  ;;  %v450_v24 = vadd.f32 %v1621_v50, %v1620_v54  ;;  %v582_v57 = vmul.f32 %v550_v43, %v1347_v49  ;;  %667 = vst [vmem:[#allocation2 + $0x90] sm:$0xff] %v635_v63 }
  0xc9   :  { %v610_v62 = vadd.f32 %v578_v59, %v1622_v2  ;;  %v638_v40 = vmax.f32 %v606_v60, 0.0  ;;  %v451_v20 = vadd.f32 %v1624_v25, %v1623_v55  ;;  %v583_v26 = vmul.f32 %v551_v14, %v1347_v49  ;;  %668 = vst [vmem:[#allocation2 + $0x98] sm:$0xff] %v636_v4 }
  0xca   :  { %v611_v28 = vadd.f32 %v579_v53, %v1625_v18  ;;  %v639_v27 = vmax.f32 %v607_v37, 0.0  ;;  %v452_v5 = vadd.f32 %v1627_v0, %v1626_v38  ;;  %v584_v22 = vmul.f32 %v552_v51, %v1347_v49  ;;  %669 = vst [vmem:[#allocation2 + $0xa0] sm:$0xff] %v637_v1 }
  0xcb   :  { %v612_v6 = vadd.f32 %v580_v7, %v1628_v29  ;;  %v640_v8 = vmax.f32 %v608_v15, 0.0  ;;  %v613_v17 = vadd.f32 %v581_v3, %v449_v56  ;;  %v641_v9 = vmax.f32 %v609_v16, 0.0  ;;  %670 = vst [vmem:[#allocation2 + $0xa8] sm:$0xff] %v638_v40 }
  0xcc   :  { %v614_v31 = vadd.f32 %v582_v57, %v450_v24  ;;  %v642_v32 = vmax.f32 %v610_v62, 0.0  ;;  %v615_v30 = vadd.f32 %v583_v26, %v451_v20  ;;  %v643_v34 = vmax.f32 %v611_v28, 0.0  ;;  %671 = vst [vmem:[#allocation2 + $0xb0] sm:$0xff] %v639_v27 }
  0xcd   :  { %v616_v36 = vadd.f32 %v584_v22, %v452_v5  ;;  %v644_v33 = vmax.f32 %v612_v6, 0.0  ;;  %672 = vst [vmem:[#allocation2 + $0xb8] sm:$0xff] %v640_v8  ;;  %v645_v21 = vmax.f32 %v613_v17, 0.0 }
  0xce   :  { %673 = vst [vmem:[#allocation2 + $0xc0] sm:$0xff] %v641_v9  ;;  %v646_v10 = vmax.f32 %v614_v31, 0.0  ;;  %v647_v49 = vmax.f32 %v615_v30, 0.0 }
  0xcf   :  { %674 = vst [vmem:[#allocation2 + $0xc8] sm:$0xff] %v642_v32  ;;  %v648_v19 = vmax.f32 %v616_v36, 0.0 }
  0xd0   :  { %675 = vst [vmem:[#allocation2 + $0xd0] sm:$0xff] %v643_v34 }
  0xd1   :  { %676 = vst [vmem:[#allocation2 + $0xd8] sm:$0xff] %v644_v33 }
  0xd2   :  { %677 = vst [vmem:[#allocation2 + $0xe0] sm:$0xff] %v645_v21 }
  0xd3   :  { %678 = vst [vmem:[#allocation2 + $0xe8] sm:$0xff] %v646_v10 }
  0xd4   :  { %679 = vst [vmem:[#allocation2 + $0xf0] sm:$0xff] %v647_v49 }
  0xd5   :  { %680 = vst [vmem:[#allocation2 + $0xf8] sm:$0xff] %v648_v19 }
  0xd6   :  { %691 = dma.vmem_to_hbm [thread:$0]  %s687_s7, 4096, %s689_s10, [#allocation3]  }
  0xd7   :  { %729 = dma.done.wait [#allocation3], 4096  }
  0xd8   :  { %730 = vsyncadd [#allocation3], 4294963200 }
  0xd9   :  { %696 = vsyncpa [#allocation3], 1 }

</bundles_post_ra>
